<compile_context>
chip_gen: v7x
topology: tpu7x:2x2x1
jax: 0.10.0
libtpu: 0.0.40
codegen_flags: <defaults>
</compile_context>

<pallas_src>
import numpy as np
import jax
import jax.numpy as jnp
from jax import lax
from jax.experimental import pallas as pl
from jax.experimental.pallas import tpu as pltpu


def lstm_pool_kernel(tokens_ref, gx_ref, whh_ref, wlin_ref, blin_ref,
                     enc_ref, extras_ref):
    T, H = enc_ref.shape

    # W_hh loaded once and cast to bf16 for the recurrent MXU matmul (f32 acc).
    whh_bf = whh_ref[...].astype(jnp.bfloat16)                     # (H, 4H)

    h = jnp.zeros((1, H), jnp.float32)
    c = jnp.zeros((1, H), jnp.float32)
    hs = []
    # Recurrence: h, c live in vregs; loop fully unrolled (T is small & static).
    for t in range(T):
        # Gather the precomputed input projection row for this token (lane-dense
        # (1,4H)=(1,128) dynamic sublane load; g-columns already pre-scaled by 2).
        gx_t = gx_ref[pl.ds(tokens_ref[t], 1), :]                  # (1, 4H)
        if t == 0:
            gates = gx_t                                           # h0 == 0: skip MXU
        else:
            gates = gx_t + jnp.dot(h.astype(jnp.bfloat16), whh_bf,
                                   preferred_element_type=jnp.float32)
        # Gate order [i, f, o, g]; single sigmoid push over all 4H lanes,
        # g = tanh(g_pre) recovered as 2*sigmoid(2*g_pre) - 1 on the VPU.
        sig = jax.nn.sigmoid(gates)                                # (1, 4H), 1 EUP push
        i_g = sig[:, 0:H]
        f_g = sig[:, H:2 * H]
        o_g = sig[:, 2 * H:3 * H]
        g_g = 2.0 * sig[:, 3 * H:4 * H] - 1.0
        c = f_g * c + i_g * g_g
        h = o_g * jnp.tanh(c)                                      # 2nd EUP push
        hs.append(h)

    # All T hidden rows are still in vregs: write encoded_outputs once.
    enc = jnp.concatenate(hs, axis=0)                              # (T, H)
    enc_ref[...] = enc

    # Pooling + per-step max/argmax, vectorized over the (T,H) value.
    avg_hidden = jnp.mean(enc, axis=0, keepdims=True)              # adaptive_avg_pool1d
    max_hidden = jnp.max(enc, axis=0, keepdims=True)               # adaptive_max_pool1d
    mx = jnp.max(enc, axis=-1, keepdims=True)                      # (T, 1)
    lane = lax.broadcasted_iota(jnp.int32, enc.shape, 1)
    am = jnp.min(jnp.where(enc == mx, lane, H),
                 axis=-1, keepdims=True)                           # first-index argmax

    # Final logit: VPU multiply + cross-lane reduce (no N=1 MXU matmul).
    cat_hidden = jnp.concatenate([h, avg_hidden, max_hidden], axis=1)   # (1, 3H)
    y = (jnp.sum(cat_hidden * wlin_ref[...], axis=-1, keepdims=True)
         + blin_ref[...])                                          # (1, 1)

    # Pack logit / max / argmax into a single small output tile:
    #   col 0 = per-step max, col 1 = argmax (as f32, exact for idx < 2^24),
    #   col 2 = logit (broadcast; wrapper reads row 0).
    extras_ref[...] = jnp.concatenate(
        [mx, am.astype(jnp.float32), jnp.broadcast_to(y, (T, 1))], axis=-1)  # (T, 3)


def lstm_pooling_classifier(tokens, params, eval_flag=False):
    # TODO(synk): eval/train mode toggling, requires_grad=False and .detach() are
    # training-time bookkeeping with no numerical effect on this forward.
    del eval_flag
    T = tokens.shape[0]
    H = params["hidden_dim"]

    smem = pl.BlockSpec(memory_space=pltpu.MemorySpace.SMEM)
    vmem = pl.BlockSpec(memory_space=pltpu.MemorySpace.VMEM)
    enc, extras = pl.pallas_call(
        lstm_pool_kernel,
        out_shape=(
            jax.ShapeDtypeStruct((T, H), jnp.float32),   # encoded_outputs
            jax.ShapeDtypeStruct((T, 3), jnp.float32),   # [max, argmax, logit]
        ),
        in_specs=[smem, vmem, vmem, vmem, vmem],
        out_specs=(vmem, vmem),
    )(tokens.astype(jnp.int32),
      params["gx_table"], params["w_hh_t"],
      params["w_lin"], params["b_lin"])

    max_act = extras[:, 0]
    argmax_idx = extras[:, 1].astype(jnp.int32)
    y_logits = extras[0:1, 2]                          # Linear(3H, 1) on cat_hidden[-1]

    value_dict = {
        "inputs": tokens.reshape(-1, 1),               # (T, 1)  (torch resize_)
        "activations": enc.reshape(T, 1, H),           # (T, 1, H) like torch
        "max_activations": max_act,
        "max_activation_index": argmax_idx,
    }
    return y_logits, value_dict


def init_params(key, vocab_size, embedding_dim, hidden_dim):
    ks = jax.random.split(key, 7)
    H = hidden_dim
    k = 1.0 / np.sqrt(H)
    enc_w = 0.1 * jax.random.normal(ks[0], (vocab_size, embedding_dim), jnp.float32)
    # raw weights in torch gate order [i, f, g, o]
    w_ih = jax.random.uniform(ks[1], (4 * H, embedding_dim), jnp.float32, -k, k)
    w_hh = jax.random.uniform(ks[2], (4 * H, H), jnp.float32, -k, k)
    b_ih = jax.random.uniform(ks[3], (4 * H,), jnp.float32, -k, k)
    b_hh = jax.random.uniform(ks[4], (4 * H,), jnp.float32, -k, k)
    kl = 1.0 / np.sqrt(3 * H)
    w_lin = jax.random.uniform(ks[5], (1, 3 * H), jnp.float32, -kl, kl)
    b_lin = jax.random.uniform(ks[6], (1,), jnp.float32, -kl, kl)

    # Permute gate rows [i,f,g,o] -> [i,f,o,g] so sigmoid-style gates are contiguous.
    perm = np.concatenate([np.arange(0, 2 * H),
                           np.arange(3 * H, 4 * H),
                           np.arange(2 * H, 3 * H)])
    w_ih_p = jnp.asarray(w_ih)[perm]                    # (4H, E)
    w_hh_p = jnp.asarray(w_hh)[perm]                    # (4H, H)
    b_p = (b_ih + b_hh)[perm]                           # (4H,)

    # Fold the 2x pre-scale of the g gate (tanh(x) = 2*sigmoid(2x) - 1) into the
    # precomputed Gx table and into W_hh -- zero runtime cost.
    scale = jnp.concatenate([jnp.ones((3 * H,), jnp.float32),
                             jnp.full((H,), 2.0, jnp.float32)])    # (4H,)
    gx_table = (enc_w @ w_ih_p.T + b_p[None, :]) * scale[None, :]  # (V, 4H)
    w_hh_t = (w_hh_p * scale[:, None]).T                           # (H, 4H)

    return {
        "encoder_weight": enc_w,
        "hidden_dim": H,
        # kernel-ready params
        "gx_table": gx_table,                                      # (V, 4H)
        "w_hh_t": w_hh_t,                                          # (H, 4H)
        "w_lin": w_lin,                                            # (1, 3H)
        "b_lin": b_lin.reshape(1, 1),                              # (1, 1)
        # raw torch-ordered params (used only by the pure-JAX reference)
        "w_ih_raw": w_ih, "w_hh_raw": w_hh,
        "b_ih_raw": b_ih, "b_hh_raw": b_hh,
        "w_lin_raw": w_lin, "b_lin_raw": b_lin,
    }


def reference(tokens, params):
    """Pure-JAX f32 reference in the original torch gate order [i,f,g,o]."""
    x = params["encoder_weight"][tokens]
    H = params["hidden_dim"]
    w_ih, w_hh = params["w_ih_raw"], params["w_hh_raw"]
    b = params["b_ih_raw"] + params["b_hh_raw"]

    def step(carry, x_t):
        h, c = carry
        gates = x_t @ w_ih.T + h @ w_hh.T + b
        i = jax.nn.sigmoid(gates[0:H])
        f = jax.nn.sigmoid(gates[H:2 * H])
        g = jnp.tanh(gates[2 * H:3 * H])
        o = jax.nn.sigmoid(gates[3 * H:4 * H])
        c = f * c + i * g
        h = o * jnp.tanh(c)
        return (h, c), h

    (h_T, _), enc = lax.scan(step, (jnp.zeros(H), jnp.zeros(H)), x)
    cat = jnp.concatenate([h_T, enc.mean(0), enc.max(0)])
    y = cat @ params["w_lin_raw"][0] + params["b_lin_raw"][0]
    return y, enc


if __name__ == "__main__":
    EMBEDDING_DIM, HIDDEN_DIM, VOCAB_SIZE, SEQ_LEN = 16, 32, 50, 8

    key = jax.random.PRNGKey(0)
    pkey, tkey = jax.random.split(key)
    params = init_params(pkey, VOCAB_SIZE, EMBEDDING_DIM, HIDDEN_DIM)
    tokens = jax.random.randint(tkey, (SEQ_LEN,), 0, VOCAB_SIZE, dtype=jnp.int32)

    y_logits, value_dict = lstm_pooling_classifier(tokens, params)
    jax.block_until_ready((y_logits, value_dict))

    y_ref, enc_ref_arr = reference(tokens, params)
    kernel_enc = np.asarray(value_dict["activations"]).reshape(SEQ_LEN, HIDDEN_DIM)

    # bf16 recurrent-matmul operands -> compare against the f32 reference with a
    # slightly loosened tolerance.
    np.testing.assert_allclose(np.asarray(y_logits), np.asarray(y_ref).reshape(1),
                               rtol=2e-2, atol=2e-2)
    np.testing.assert_allclose(kernel_enc, np.asarray(enc_ref_arr),
                               rtol=2e-2, atol=2e-2)
    # max / argmax are defined on the module's OWN activations -> exact
    # self-consistency checks against the kernel's encoded outputs.
    np.testing.assert_allclose(np.asarray(value_dict["max_activations"]),
                               kernel_enc.max(-1), rtol=0, atol=0)
    np.testing.assert_array_equal(np.asarray(value_dict["max_activation_index"]),
                                  kernel_enc.argmax(-1))

    print("KERNEL_OK")
</pallas_src>

<mosaic_0001>
module attributes {stable_mosaic.version = 11 : i64} {
  func.func @lstm_pool_kernel(%arg0: memref<8xi32, #tpu.memory_space<smem>>, %arg1: memref<50x128xf32, #tpu.memory_space<vmem>>, %arg2: memref<32x128xf32, #tpu.memory_space<vmem>>, %arg3: memref<1x96xf32, #tpu.memory_space<vmem>>, %arg4: memref<1x1xf32, #tpu.memory_space<vmem>>, %arg5: memref<8x32xf32, #tpu.memory_space<vmem>>, %arg6: memref<8x3xf32, #tpu.memory_space<vmem>>) attributes {dimension_semantics = [], scalar_prefetch = 0 : i64, scratch_operands = 0 : i64, tpu.core_type = #tpu.core_type<tc>} {
    %c0 = arith.constant 0 : index
    %c0_0 = arith.constant 0 : index
    %0 = vector.load %arg2[%c0, %c0_0] : memref<32x128xf32, #tpu.memory_space<vmem>>, vector<32x128xf32>
    %1 = arith.truncf %0 : vector<32x128xf32> to vector<32x128xbf16>
    %cst = arith.constant 0.000000e+00 : f32
    %2 = vector.broadcast %cst : f32 to vector<1x32xf32>
    %c0_1 = arith.constant 0 : index
    %3 = memref.load %arg0[%c0_1] : memref<8xi32, #tpu.memory_space<smem>>
    %4 = arith.index_cast %3 : i32 to index
    %c0_2 = arith.constant 0 : index
    %5 = vector.load %arg1[%4, %c0_2] : memref<50x128xf32, #tpu.memory_space<vmem>>, vector<1x128xf32>
    %6 = arith.negf %5 : vector<1x128xf32>
    %7 = math.exp %6 : vector<1x128xf32>
    %cst_3 = arith.constant 1.000000e+00 : f32
    %8 = vector.broadcast %cst_3 : f32 to vector<1x128xf32>
    %9 = arith.addf %8, %7 : vector<1x128xf32>
    %10 = arith.divf %8, %9 : vector<1x128xf32>
    %11 = vector.extract_strided_slice %10 {offsets = [0, 0], sizes = [1, 32], strides = [1, 1]} : vector<1x128xf32> to vector<1x32xf32>
    %12 = vector.extract_strided_slice %10 {offsets = [0, 32], sizes = [1, 32], strides = [1, 1]} : vector<1x128xf32> to vector<1x32xf32>
    %13 = vector.extract_strided_slice %10 {offsets = [0, 64], sizes = [1, 32], strides = [1, 1]} : vector<1x128xf32> to vector<1x32xf32>
    %14 = vector.extract_strided_slice %10 {offsets = [0, 96], sizes = [1, 32], strides = [1, 1]} : vector<1x128xf32> to vector<1x32xf32>
    %cst_4 = arith.constant 2.000000e+00 : f32
    %15 = vector.broadcast %cst_4 : f32 to vector<1x32xf32>
    %16 = arith.mulf %15, %14 : vector<1x32xf32>
    %cst_5 = arith.constant 1.000000e+00 : f32
    %17 = vector.broadcast %cst_5 : f32 to vector<1x32xf32>
    %18 = arith.subf %16, %17 : vector<1x32xf32>
    %19 = arith.mulf %12, %2 : vector<1x32xf32>
    %20 = arith.mulf %11, %18 : vector<1x32xf32>
    %21 = arith.addf %19, %20 : vector<1x32xf32>
    %22 = math.tanh %21 : vector<1x32xf32>
    %23 = arith.mulf %13, %22 : vector<1x32xf32>
    %c1 = arith.constant 1 : index
    %24 = memref.load %arg0[%c1] : memref<8xi32, #tpu.memory_space<smem>>
    %25 = arith.index_cast %24 : i32 to index
    %c0_6 = arith.constant 0 : index
    %26 = vector.load %arg1[%25, %c0_6] : memref<50x128xf32, #tpu.memory_space<vmem>>, vector<1x128xf32>
    %27 = arith.truncf %23 : vector<1x32xf32> to vector<1x32xbf16>
    %cst_7 = arith.constant dense<0.000000e+00> : vector<1x128xf32>
    %28 = tpu.matmul %27, %1, %cst_7 {dimension_numbers = #tpu.dot_dimension_numbers<[1], [0], [0], [1], [0, 0, 1, 1], [], []>} : vector<1x32xbf16>, vector<32x128xbf16>, vector<1x128xf32> -> vector<1x128xf32>
    %29 = arith.addf %26, %28 : vector<1x128xf32>
    %30 = arith.negf %29 : vector<1x128xf32>
    %31 = math.exp %30 : vector<1x128xf32>
    %cst_8 = arith.constant 1.000000e+00 : f32
    %32 = vector.broadcast %cst_8 : f32 to vector<1x128xf32>
    %33 = arith.addf %32, %31 : vector<1x128xf32>
    %34 = arith.divf %32, %33 : vector<1x128xf32>
    %35 = vector.extract_strided_slice %34 {offsets = [0, 0], sizes = [1, 32], strides = [1, 1]} : vector<1x128xf32> to vector<1x32xf32>
    %36 = vector.extract_strided_slice %34 {offsets = [0, 32], sizes = [1, 32], strides = [1, 1]} : vector<1x128xf32> to vector<1x32xf32>
    %37 = vector.extract_strided_slice %34 {offsets = [0, 64], sizes = [1, 32], strides = [1, 1]} : vector<1x128xf32> to vector<1x32xf32>
    %38 = vector.extract_strided_slice %34 {offsets = [0, 96], sizes = [1, 32], strides = [1, 1]} : vector<1x128xf32> to vector<1x32xf32>
    %cst_9 = arith.constant 2.000000e+00 : f32
    %39 = vector.broadcast %cst_9 : f32 to vector<1x32xf32>
    %40 = arith.mulf %39, %38 : vector<1x32xf32>
    %cst_10 = arith.constant 1.000000e+00 : f32
    %41 = vector.broadcast %cst_10 : f32 to vector<1x32xf32>
    %42 = arith.subf %40, %41 : vector<1x32xf32>
    %43 = arith.mulf %36, %21 : vector<1x32xf32>
    %44 = arith.mulf %35, %42 : vector<1x32xf32>
    %45 = arith.addf %43, %44 : vector<1x32xf32>
    %46 = math.tanh %45 : vector<1x32xf32>
    %47 = arith.mulf %37, %46 : vector<1x32xf32>
    %c2 = arith.constant 2 : index
    %48 = memref.load %arg0[%c2] : memref<8xi32, #tpu.memory_space<smem>>
    %49 = arith.index_cast %48 : i32 to index
    %c0_11 = arith.constant 0 : index
    %50 = vector.load %arg1[%49, %c0_11] : memref<50x128xf32, #tpu.memory_space<vmem>>, vector<1x128xf32>
    %51 = arith.truncf %47 : vector<1x32xf32> to vector<1x32xbf16>
    %cst_12 = arith.constant dense<0.000000e+00> : vector<1x128xf32>
    %52 = tpu.matmul %51, %1, %cst_12 {dimension_numbers = #tpu.dot_dimension_numbers<[1], [0], [0], [1], [0, 0, 1, 1], [], []>} : vector<1x32xbf16>, vector<32x128xbf16>, vector<1x128xf32> -> vector<1x128xf32>
    %53 = arith.addf %50, %52 : vector<1x128xf32>
    %54 = arith.negf %53 : vector<1x128xf32>
    %55 = math.exp %54 : vector<1x128xf32>
    %cst_13 = arith.constant 1.000000e+00 : f32
    %56 = vector.broadcast %cst_13 : f32 to vector<1x128xf32>
    %57 = arith.addf %56, %55 : vector<1x128xf32>
    %58 = arith.divf %56, %57 : vector<1x128xf32>
    %59 = vector.extract_strided_slice %58 {offsets = [0, 0], sizes = [1, 32], strides = [1, 1]} : vector<1x128xf32> to vector<1x32xf32>
    %60 = vector.extract_strided_slice %58 {offsets = [0, 32], sizes = [1, 32], strides = [1, 1]} : vector<1x128xf32> to vector<1x32xf32>
    %61 = vector.extract_strided_slice %58 {offsets = [0, 64], sizes = [1, 32], strides = [1, 1]} : vector<1x128xf32> to vector<1x32xf32>
    %62 = vector.extract_strided_slice %58 {offsets = [0, 96], sizes = [1, 32], strides = [1, 1]} : vector<1x128xf32> to vector<1x32xf32>
    %cst_14 = arith.constant 2.000000e+00 : f32
    %63 = vector.broadcast %cst_14 : f32 to vector<1x32xf32>
    %64 = arith.mulf %63, %62 : vector<1x32xf32>
    %cst_15 = arith.constant 1.000000e+00 : f32
    %65 = vector.broadcast %cst_15 : f32 to vector<1x32xf32>
    %66 = arith.subf %64, %65 : vector<1x32xf32>
    %67 = arith.mulf %60, %45 : vector<1x32xf32>
    %68 = arith.mulf %59, %66 : vector<1x32xf32>
    %69 = arith.addf %67, %68 : vector<1x32xf32>
    %70 = math.tanh %69 : vector<1x32xf32>
    %71 = arith.mulf %61, %70 : vector<1x32xf32>
    %c3 = arith.constant 3 : index
    %72 = memref.load %arg0[%c3] : memref<8xi32, #tpu.memory_space<smem>>
    %73 = arith.index_cast %72 : i32 to index
    %c0_16 = arith.constant 0 : index
    %74 = vector.load %arg1[%73, %c0_16] : memref<50x128xf32, #tpu.memory_space<vmem>>, vector<1x128xf32>
    %75 = arith.truncf %71 : vector<1x32xf32> to vector<1x32xbf16>
    %cst_17 = arith.constant dense<0.000000e+00> : vector<1x128xf32>
    %76 = tpu.matmul %75, %1, %cst_17 {dimension_numbers = #tpu.dot_dimension_numbers<[1], [0], [0], [1], [0, 0, 1, 1], [], []>} : vector<1x32xbf16>, vector<32x128xbf16>, vector<1x128xf32> -> vector<1x128xf32>
    %77 = arith.addf %74, %76 : vector<1x128xf32>
    %78 = arith.negf %77 : vector<1x128xf32>
    %79 = math.exp %78 : vector<1x128xf32>
    %cst_18 = arith.constant 1.000000e+00 : f32
    %80 = vector.broadcast %cst_18 : f32 to vector<1x128xf32>
    %81 = arith.addf %80, %79 : vector<1x128xf32>
    %82 = arith.divf %80, %81 : vector<1x128xf32>
    %83 = vector.extract_strided_slice %82 {offsets = [0, 0], sizes = [1, 32], strides = [1, 1]} : vector<1x128xf32> to vector<1x32xf32>
    %84 = vector.extract_strided_slice %82 {offsets = [0, 32], sizes = [1, 32], strides = [1, 1]} : vector<1x128xf32> to vector<1x32xf32>
    %85 = vector.extract_strided_slice %82 {offsets = [0, 64], sizes = [1, 32], strides = [1, 1]} : vector<1x128xf32> to vector<1x32xf32>
    %86 = vector.extract_strided_slice %82 {offsets = [0, 96], sizes = [1, 32], strides = [1, 1]} : vector<1x128xf32> to vector<1x32xf32>
    %cst_19 = arith.constant 2.000000e+00 : f32
    %87 = vector.broadcast %cst_19 : f32 to vector<1x32xf32>
    %88 = arith.mulf %87, %86 : vector<1x32xf32>
    %cst_20 = arith.constant 1.000000e+00 : f32
    %89 = vector.broadcast %cst_20 : f32 to vector<1x32xf32>
    %90 = arith.subf %88, %89 : vector<1x32xf32>
    %91 = arith.mulf %84, %69 : vector<1x32xf32>
    %92 = arith.mulf %83, %90 : vector<1x32xf32>
    %93 = arith.addf %91, %92 : vector<1x32xf32>
    %94 = math.tanh %93 : vector<1x32xf32>
    %95 = arith.mulf %85, %94 : vector<1x32xf32>
    %c4 = arith.constant 4 : index
    %96 = memref.load %arg0[%c4] : memref<8xi32, #tpu.memory_space<smem>>
    %97 = arith.index_cast %96 : i32 to index
    %c0_21 = arith.constant 0 : index
    %98 = vector.load %arg1[%97, %c0_21] : memref<50x128xf32, #tpu.memory_space<vmem>>, vector<1x128xf32>
    %99 = arith.truncf %95 : vector<1x32xf32> to vector<1x32xbf16>
    %cst_22 = arith.constant dense<0.000000e+00> : vector<1x128xf32>
    %100 = tpu.matmul %99, %1, %cst_22 {dimension_numbers = #tpu.dot_dimension_numbers<[1], [0], [0], [1], [0, 0, 1, 1], [], []>} : vector<1x32xbf16>, vector<32x128xbf16>, vector<1x128xf32> -> vector<1x128xf32>
    %101 = arith.addf %98, %100 : vector<1x128xf32>
    %102 = arith.negf %101 : vector<1x128xf32>
    %103 = math.exp %102 : vector<1x128xf32>
    %cst_23 = arith.constant 1.000000e+00 : f32
    %104 = vector.broadcast %cst_23 : f32 to vector<1x128xf32>
    %105 = arith.addf %104, %103 : vector<1x128xf32>
    %106 = arith.divf %104, %105 : vector<1x128xf32>
    %107 = vector.extract_strided_slice %106 {offsets = [0, 0], sizes = [1, 32], strides = [1, 1]} : vector<1x128xf32> to vector<1x32xf32>
    %108 = vector.extract_strided_slice %106 {offsets = [0, 32], sizes = [1, 32], strides = [1, 1]} : vector<1x128xf32> to vector<1x32xf32>
    %109 = vector.extract_strided_slice %106 {offsets = [0, 64], sizes = [1, 32], strides = [1, 1]} : vector<1x128xf32> to vector<1x32xf32>
    %110 = vector.extract_strided_slice %106 {offsets = [0, 96], sizes = [1, 32], strides = [1, 1]} : vector<1x128xf32> to vector<1x32xf32>
    %cst_24 = arith.constant 2.000000e+00 : f32
    %111 = vector.broadcast %cst_24 : f32 to vector<1x32xf32>
    %112 = arith.mulf %111, %110 : vector<1x32xf32>
    %cst_25 = arith.constant 1.000000e+00 : f32
    %113 = vector.broadcast %cst_25 : f32 to vector<1x32xf32>
    %114 = arith.subf %112, %113 : vector<1x32xf32>
    %115 = arith.mulf %108, %93 : vector<1x32xf32>
    %116 = arith.mulf %107, %114 : vector<1x32xf32>
    %117 = arith.addf %115, %116 : vector<1x32xf32>
    %118 = math.tanh %117 : vector<1x32xf32>
    %119 = arith.mulf %109, %118 : vector<1x32xf32>
    %c5 = arith.constant 5 : index
    %120 = memref.load %arg0[%c5] : memref<8xi32, #tpu.memory_space<smem>>
    %121 = arith.index_cast %120 : i32 to index
    %c0_26 = arith.constant 0 : index
    %122 = vector.load %arg1[%121, %c0_26] : memref<50x128xf32, #tpu.memory_space<vmem>>, vector<1x128xf32>
    %123 = arith.truncf %119 : vector<1x32xf32> to vector<1x32xbf16>
    %cst_27 = arith.constant dense<0.000000e+00> : vector<1x128xf32>
    %124 = tpu.matmul %123, %1, %cst_27 {dimension_numbers = #tpu.dot_dimension_numbers<[1], [0], [0], [1], [0, 0, 1, 1], [], []>} : vector<1x32xbf16>, vector<32x128xbf16>, vector<1x128xf32> -> vector<1x128xf32>
    %125 = arith.addf %122, %124 : vector<1x128xf32>
    %126 = arith.negf %125 : vector<1x128xf32>
    %127 = math.exp %126 : vector<1x128xf32>
    %cst_28 = arith.constant 1.000000e+00 : f32
    %128 = vector.broadcast %cst_28 : f32 to vector<1x128xf32>
    %129 = arith.addf %128, %127 : vector<1x128xf32>
    %130 = arith.divf %128, %129 : vector<1x128xf32>
    %131 = vector.extract_strided_slice %130 {offsets = [0, 0], sizes = [1, 32], strides = [1, 1]} : vector<1x128xf32> to vector<1x32xf32>
    %132 = vector.extract_strided_slice %130 {offsets = [0, 32], sizes = [1, 32], strides = [1, 1]} : vector<1x128xf32> to vector<1x32xf32>
    %133 = vector.extract_strided_slice %130 {offsets = [0, 64], sizes = [1, 32], strides = [1, 1]} : vector<1x128xf32> to vector<1x32xf32>
    %134 = vector.extract_strided_slice %130 {offsets = [0, 96], sizes = [1, 32], strides = [1, 1]} : vector<1x128xf32> to vector<1x32xf32>
    %cst_29 = arith.constant 2.000000e+00 : f32
    %135 = vector.broadcast %cst_29 : f32 to vector<1x32xf32>
    %136 = arith.mulf %135, %134 : vector<1x32xf32>
    %cst_30 = arith.constant 1.000000e+00 : f32
    %137 = vector.broadcast %cst_30 : f32 to vector<1x32xf32>
    %138 = arith.subf %136, %137 : vector<1x32xf32>
    %139 = arith.mulf %132, %117 : vector<1x32xf32>
    %140 = arith.mulf %131, %138 : vector<1x32xf32>
    %141 = arith.addf %139, %140 : vector<1x32xf32>
    %142 = math.tanh %141 : vector<1x32xf32>
    %143 = arith.mulf %133, %142 : vector<1x32xf32>
    %c6 = arith.constant 6 : index
    %144 = memref.load %arg0[%c6] : memref<8xi32, #tpu.memory_space<smem>>
    %145 = arith.index_cast %144 : i32 to index
    %c0_31 = arith.constant 0 : index
    %146 = vector.load %arg1[%145, %c0_31] : memref<50x128xf32, #tpu.memory_space<vmem>>, vector<1x128xf32>
    %147 = arith.truncf %143 : vector<1x32xf32> to vector<1x32xbf16>
    %cst_32 = arith.constant dense<0.000000e+00> : vector<1x128xf32>
    %148 = tpu.matmul %147, %1, %cst_32 {dimension_numbers = #tpu.dot_dimension_numbers<[1], [0], [0], [1], [0, 0, 1, 1], [], []>} : vector<1x32xbf16>, vector<32x128xbf16>, vector<1x128xf32> -> vector<1x128xf32>
    %149 = arith.addf %146, %148 : vector<1x128xf32>
    %150 = arith.negf %149 : vector<1x128xf32>
    %151 = math.exp %150 : vector<1x128xf32>
    %cst_33 = arith.constant 1.000000e+00 : f32
    %152 = vector.broadcast %cst_33 : f32 to vector<1x128xf32>
    %153 = arith.addf %152, %151 : vector<1x128xf32>
    %154 = arith.divf %152, %153 : vector<1x128xf32>
    %155 = vector.extract_strided_slice %154 {offsets = [0, 0], sizes = [1, 32], strides = [1, 1]} : vector<1x128xf32> to vector<1x32xf32>
    %156 = vector.extract_strided_slice %154 {offsets = [0, 32], sizes = [1, 32], strides = [1, 1]} : vector<1x128xf32> to vector<1x32xf32>
    %157 = vector.extract_strided_slice %154 {offsets = [0, 64], sizes = [1, 32], strides = [1, 1]} : vector<1x128xf32> to vector<1x32xf32>
    %158 = vector.extract_strided_slice %154 {offsets = [0, 96], sizes = [1, 32], strides = [1, 1]} : vector<1x128xf32> to vector<1x32xf32>
    %cst_34 = arith.constant 2.000000e+00 : f32
    %159 = vector.broadcast %cst_34 : f32 to vector<1x32xf32>
    %160 = arith.mulf %159, %158 : vector<1x32xf32>
    %cst_35 = arith.constant 1.000000e+00 : f32
    %161 = vector.broadcast %cst_35 : f32 to vector<1x32xf32>
    %162 = arith.subf %160, %161 : vector<1x32xf32>
    %163 = arith.mulf %156, %141 : vector<1x32xf32>
    %164 = arith.mulf %155, %162 : vector<1x32xf32>
    %165 = arith.addf %163, %164 : vector<1x32xf32>
    %166 = math.tanh %165 : vector<1x32xf32>
    %167 = arith.mulf %157, %166 : vector<1x32xf32>
    %c7 = arith.constant 7 : index
    %168 = memref.load %arg0[%c7] : memref<8xi32, #tpu.memory_space<smem>>
    %169 = arith.index_cast %168 : i32 to index
    %c0_36 = arith.constant 0 : index
    %170 = vector.load %arg1[%169, %c0_36] : memref<50x128xf32, #tpu.memory_space<vmem>>, vector<1x128xf32>
    %171 = arith.truncf %167 : vector<1x32xf32> to vector<1x32xbf16>
    %cst_37 = arith.constant dense<0.000000e+00> : vector<1x128xf32>
    %172 = tpu.matmul %171, %1, %cst_37 {dimension_numbers = #tpu.dot_dimension_numbers<[1], [0], [0], [1], [0, 0, 1, 1], [], []>} : vector<1x32xbf16>, vector<32x128xbf16>, vector<1x128xf32> -> vector<1x128xf32>
    %173 = arith.addf %170, %172 : vector<1x128xf32>
    %174 = arith.negf %173 : vector<1x128xf32>
    %175 = math.exp %174 : vector<1x128xf32>
    %cst_38 = arith.constant 1.000000e+00 : f32
    %176 = vector.broadcast %cst_38 : f32 to vector<1x128xf32>
    %177 = arith.addf %176, %175 : vector<1x128xf32>
    %178 = arith.divf %176, %177 : vector<1x128xf32>
    %179 = vector.extract_strided_slice %178 {offsets = [0, 0], sizes = [1, 32], strides = [1, 1]} : vector<1x128xf32> to vector<1x32xf32>
    %180 = vector.extract_strided_slice %178 {offsets = [0, 32], sizes = [1, 32], strides = [1, 1]} : vector<1x128xf32> to vector<1x32xf32>
    %181 = vector.extract_strided_slice %178 {offsets = [0, 64], sizes = [1, 32], strides = [1, 1]} : vector<1x128xf32> to vector<1x32xf32>
    %182 = vector.extract_strided_slice %178 {offsets = [0, 96], sizes = [1, 32], strides = [1, 1]} : vector<1x128xf32> to vector<1x32xf32>
    %cst_39 = arith.constant 2.000000e+00 : f32
    %183 = vector.broadcast %cst_39 : f32 to vector<1x32xf32>
    %184 = arith.mulf %183, %182 : vector<1x32xf32>
    %cst_40 = arith.constant 1.000000e+00 : f32
    %185 = vector.broadcast %cst_40 : f32 to vector<1x32xf32>
    %186 = arith.subf %184, %185 : vector<1x32xf32>
    %187 = arith.mulf %180, %165 : vector<1x32xf32>
    %188 = arith.mulf %179, %186 : vector<1x32xf32>
    %189 = arith.addf %187, %188 : vector<1x32xf32>
    %190 = math.tanh %189 : vector<1x32xf32>
    %191 = arith.mulf %181, %190 : vector<1x32xf32>
    %192 = tpu.concatenate %23, %47, %71, %95, %119, %143, %167, %191 in 0 : vector<1x32xf32>, vector<1x32xf32>, vector<1x32xf32>, vector<1x32xf32>, vector<1x32xf32>, vector<1x32xf32>, vector<1x32xf32>, vector<1x32xf32> -> vector<8x32xf32>
    %c0_41 = arith.constant 0 : index
    %c0_42 = arith.constant 0 : index
    %193 = vector.load %arg5[%c0_41, %c0_42] : memref<8x32xf32, #tpu.memory_space<vmem>>, vector<8x32xf32>
    tpu.vector_store %arg5[%c0_41, %c0_42], %192 {strides = array<i32>} : memref<8x32xf32, #tpu.memory_space<vmem>>, vector<8x32xf32>,
    %cst_43 = arith.constant dense<0.000000e+00> : vector<32xf32>
    %194 = vector.multi_reduction <add>, %192, %cst_43 [0] : vector<8x32xf32> to vector<32xf32>
    %195 = vector.shape_cast %194 : vector<32xf32> to vector<1x32xf32>
    %cst_44 = arith.constant 8.000000e+00 : f32
    %196 = vector.broadcast %cst_44 : f32 to vector<1x32xf32>
    %197 = arith.divf %195, %196 : vector<1x32xf32>
    %cst_45 = arith.constant dense<0xFF800000> : vector<32xf32>
    %198 = vector.multi_reduction <maximumf>, %192, %cst_45 [0] : vector<8x32xf32> to vector<32xf32>
    %199 = vector.shape_cast %198 : vector<32xf32> to vector<1x32xf32>
    %cst_46 = arith.constant dense<0xFF800000> : vector<8xf32>
    %200 = vector.multi_reduction <maximumf>, %192, %cst_46 [1] : vector<8x32xf32> to vector<8xf32>
    %201 = vector.shape_cast %200 : vector<8xf32> to vector<8x1xf32>
    %202 = tpu.iota {dimensions = array<i32: 1>} : vector<8x32xi32>
    %203 = vector.broadcast %201 : vector<8x1xf32> to vector<8x32xf32>
    %204 = arith.cmpf oeq, %192, %203 : vector<8x32xf32>
    %c32_i32 = arith.constant 32 : i32
    %205 = vector.broadcast %c32_i32 : i32 to vector<8x32xi32>
    %206 = arith.select %204, %202, %205 : vector<8x32xi1>, vector<8x32xi32>
    %cst_47 = arith.constant dense<2147483647> : vector<8xi32>
    %207 = vector.multi_reduction <minsi>, %206, %cst_47 [1] : vector<8x32xi32> to vector<8xi32>
    %208 = vector.shape_cast %207 : vector<8xi32> to vector<8x1xi32>
    %209 = tpu.concatenate %191, %197, %199 in 1 : vector<1x32xf32>, vector<1x32xf32>, vector<1x32xf32> -> vector<1x96xf32>
    %c0_48 = arith.constant 0 : index
    %c0_49 = arith.constant 0 : index
    %210 = vector.load %arg3[%c0_48, %c0_49] : memref<1x96xf32, #tpu.memory_space<vmem>>, vector<1x96xf32>
    %211 = arith.mulf %209, %210 : vector<1x96xf32>
    %cst_50 = arith.constant dense<0.000000e+00> : vector<1xf32>
    %212 = vector.multi_reduction <add>, %211, %cst_50 [1] : vector<1x96xf32> to vector<1xf32>
    %213 = vector.shape_cast %212 : vector<1xf32> to vector<1x1xf32>
    %c0_51 = arith.constant 0 : index
    %c0_52 = arith.constant 0 : index
    %214 = vector.load %arg4[%c0_51, %c0_52] : memref<1x1xf32, #tpu.memory_space<vmem>>, vector<1x1xf32>
    %215 = arith.addf %213, %214 : vector<1x1xf32>
    %216 = arith.sitofp %208 : vector<8x1xi32> to vector<8x1xf32>
    %217 = vector.shape_cast %215 : vector<1x1xf32> to vector<1x1xf32>
    %218 = vector.broadcast %217 : vector<1x1xf32> to vector<8x1xf32>
    %219 = tpu.concatenate %201, %216, %218 in 1 : vector<8x1xf32>, vector<8x1xf32>, vector<8x1xf32> -> vector<8x3xf32>
    %c0_53 = arith.constant 0 : index
    %c0_54 = arith.constant 0 : index
    %220 = vector.load %arg6[%c0_53, %c0_54] : memref<8x3xf32, #tpu.memory_space<vmem>>, vector<8x3xf32>
    tpu.vector_store %arg6[%c0_53, %c0_54], %219 {strides = array<i32>} : memref<8x3xf32, #tpu.memory_space<vmem>>, vector<8x3xf32>,
    return
  }
}

</mosaic_0001>

<bundles_post_ra>
// kernel: tpu_custom_call.1
= control target key start
LH: loop header
LB: loop body
LE: loop exit
PB: predicated region body
PF: predicated region fallthrough
CT: control target
= control target key end

     0   :  { %s1224_s0 = inlined_call_operand.vmem [shape: s32[8], index: 0, kind: input, shape index: {}]   ;;  %s1225_s1 = inlined_call_operand.hbm [shape: f32[50,128], index: 1, kind: input, shape index: {}]   ;;  %s1226_s2 = inlined_call_operand.hbm [shape: f32[32,128], index: 2, kind: input, shape index: {}]   ;;  %s1227_s3 = inlined_call_operand.vmem [shape: f32[1,96], index: 3, kind: input, shape index: {}]   ;;  %s1228_s4 = inlined_call_operand.<no memory space> [shape: f32[1,1], index: 4, kind: input, shape index: {}]   ;;  %s1229_s5 = inlined_call_operand.hbm [shape: f32[8,32], index: 5, kind: output, shape index: {0}]   ;;  %s1230_s6 = inlined_call_operand.vmem [shape: f32[8,3], index: 6, kind: output, shape index: {1}]  }
   0x1   :  { %v12_v0 = vstv %s1228_s4 }
   0x2   :  { %13 = vst [vmem:[#allocation2] sm:$0x1] %v12_v0 }
   0x3   :  { %14 = vsyncpa [#allocation6], 0 }
   0x4   :  { %15 = vsyncpa [#allocation4], 0 }
   0x5   :  { %16 = vsyncpa [#allocation9], 0 }
   0x6   :  { %17 = vsyncpa [#allocation5], 0  ;;  %s24_s25 = sshll.u32 %s1224_s0, 4  ;;  %s25_s25 = int_to_ptr.vmem [resolvable:$true] %s24_s25 }
   0x7   :  { %s943_s26 = scalar_lea.vmem %s25_s25, 16  ;;  %p948_p1 = scmp.lt.s32.totalorder %s25_s25, %s25_s25 }
   0x8   :  { %p944_p0 = scmp.ne.s32.totalorder %s25_s25, %s943_s26  ;;  %p949_p2 = scmp.lt.s32.totalorder %s943_s26, %s943_s26 }
   0xa   :  { %p950_p3 = por %p949_p2, %p948_p1 }
   0xc   :  { %p951_p4 = pnand %p950_p3, %p944_p0 }
   0xe   :  { %954 = shalt.err (!%p951_p4)
}
   0xf   :  { %s1029_s27 = smov [#allocation3]   ;;  %s1030_s4 = smov [#allocation7]  }
  0x10   :  { %27 = dma.vmem_to_smem %s25_s25, 16, %s1029_s27, [#allocation6]  }
  0x11   :  { %s33_s28 = sshll.u32 %s1030_s4, 4  ;;  %s955_s7 = scalar_lea.hbm %s1225_s1, 896  ;;  %s34_s28 = int_to_ptr.vmem [resolvable:$true] %s33_s28 }
  0x12   :  { %p956_p5 = scmp.ne.s32.totalorder %s1225_s1, %s955_s7  ;;  %p959_p6 = scmp.lt.u32.totalorder %s955_s7, %s1225_s1 }
  0x14   :  { %p961_p7 = pnand %p959_p6, %p956_p5 }
  0x16   :  { %964 = shalt.err (!%p961_p7)
}
  0x17   :  { %s965_s11 = scalar_lea.vmem %s34_s28, 896  ;;  %p970_p9 = scmp.lt.s32.totalorder %s34_s28, %s34_s28 }
  0x18   :  { %p966_p8 = scmp.ne.s32.totalorder %s34_s28, %s965_s11  ;;  %p971_p10 = scmp.lt.s32.totalorder %s965_s11, %s965_s11 }
  0x1a   :  { %p972_p11 = por %p971_p10, %p970_p9 }
  0x1c   :  { %p973_p12 = pnand %p972_p11, %p966_p8 }
  0x1e   :  { %976 = shalt.err (!%p973_p12)
}
  0x1f   :  { %s1031_s12 = smov 128   ;;  %s1032_s13 = smov 8  }
  0x20   :  { %39 = dma.hbm_to_vmem [thread:$0]  %s1225_s1, 896, %s34_s28, [#allocation4], %s1031_s12, %s1031_s12, %s1032_s13  }
  0x21   :  { %s1033_s16 = smov [#allocation8]   ;;  %s977_s20 = scalar_lea.hbm %s1226_s2, 512 }
  0x22   :  { %s45_s17 = sshll.u32 %s1033_s16, 4  ;;  %p978_p13 = scmp.ne.s32.totalorder %s1226_s2, %s977_s20  ;;  %s46_s17 = int_to_ptr.vmem [resolvable:$true] %s45_s17 }
  0x23   :  { %p981_p0 = scmp.lt.u32.totalorder %s977_s20, %s1226_s2 }
  0x25   :  { %p983_p1 = pnand %p981_p0, %p978_p13 }
  0x27   :  { %986 = shalt.err (!%p983_p1)
}
  0x28   :  { %s987_s25 = scalar_lea.vmem %s46_s17, 512  ;;  %p992_p3 = scmp.lt.s32.totalorder %s46_s17, %s46_s17 }
  0x29   :  { %p988_p2 = scmp.ne.s32.totalorder %s46_s17, %s987_s25  ;;  %p993_p4 = scmp.lt.s32.totalorder %s987_s25, %s987_s25 }
  0x2b   :  { %p994_p5 = por %p993_p4, %p992_p3 }
  0x2d   :  { %p995_p6 = pnand %p994_p5, %p988_p2 }
  0x2f   :  { %998 = shalt.err (!%p995_p6)
}
  0x30   :  { %51 = dma.hbm_to_vmem [thread:$0]  %s1226_s2, 512, %s46_s17, [#allocation9], %s1031_s12, %s1031_s12, %s1032_s13  }
  0x31   :  { %1021 = dma.done.wait [#allocation6], 16  }
  0x32   :  { %1022 = vsyncadd [#allocation6], 4294967280 }
  0x33   :  { %1023 = dma.done.wait [#allocation4], 896  }
  0x34   :  { %1024 = vsyncadd [#allocation4], 4294966400 }
  0x35   :  { %1025 = dma.done.wait [#allocation9], 512  }
  0x36   :  { %1026 = vsyncadd [#allocation9], 4294966784 }
  0x37   :  { %65 = sfence }
  0x38   :  { %s73_s27 = sld [smem:[#allocation3]]  ;;  %s1034_s28 = smov 32   ;;  %v67_v13 = vld [vmem:[#allocation8] sm:$0xff]  ;;  %v68_v14 = vld [vmem:[#allocation8 + $0x8] sm:$0xff]  ;;  %v69_v15 = vld [vmem:[#allocation8 + $0x10] sm:$0xff]  ;;  %v1035_v16 = vmov 0.0  }
  0x39   :  { %827 = vmatprep.subr.bf16.mxu0 %v1035_v16  ;;  %v1109_v17 = vpack.c.bf16 %v68_v14, %v67_v13  ;;  %v70_v18 = vld [vmem:[#allocation8 + $0x18] sm:$0xff]  ;;  %vm1036_vm0 = vmmov 0   ;;  %835 = vmatprep.subr.bf16.mxu1 %v1035_v16  ;;  %s1037_s2 = smov 64   ;;  %vm108_vm1 = vcmask 261120   ;;  %s778_s29 = sld [smem:[#allocation3 + $0x1]]  ;;  %vm655_vm2 = vcmask 1040384  }
  0x3a   :  { %831 = vmatprep.mubr.msk.bf16.mxu0 %vm1036_vm0, %v1035_v16  ;;  %839 = vmatprep.mubr.msk.bf16.mxu1 %vm1036_vm0, %v1035_v16  ;;  %v1117_v19 = vpack.c.bf16 %v70_v18, %v69_v15  ;;  %s782_s7 = sld [smem:[#allocation3 + $0x2]]  ;;  %vm657_vm3 = vcmask 1041408   ;;  %s786_s9 = sld [smem:[#allocation3 + $0x3]]  ;;  %vm659_vm4 = vcmask 1042432   ;;  %vm661_vm5 = vcmask 1043456  }
  0x3b   :  { %828 = vmatpush3.bf16.msra.mxu0 %v1109_v17  ;;  %836 = vmatpush3.bf16.msra.mxu1 %v1109_v17  ;;  %s790_s10 = sld [smem:[#allocation3 + $0x4]]  ;;  %s794_s12 = sld [smem:[#allocation3 + $0x5]]  ;;  %vm663_vm6 = vcmask 1044480   ;;  %vm665_vm7 = vcmask 1045504   ;;  %vm667_vm8 = vcmask 1046528   ;;  %vm674_vm9 = vcmask 785920  }
  0x3c   :  { %829 = vmatprep.subr.bf16.mxu0 %v1035_v16  ;;  %837 = vmatprep.subr.bf16.mxu1 %v1035_v16  ;;  %s798_s14 = sld [smem:[#allocation3 + $0x6]]  ;;  %s802_s16 = sld [smem:[#allocation3 + $0x7]]  ;;  %vm722_vm10 = vcmask 523264   ;;  %vm726_vm11 = vcmask 778240   ;;  %vm741_vm14 = vcmask 7168   ;;  %vm743_vm15 = vcmask 15360  }
  0x3d   :  { %s1038_s18 = smov 96   ;;  %s1040_s21 = smov [#allocation10]  }
  0x3e   :  { %s74_s4 = scalar_lea.vmem [#allocation7], %s73_s27  ;;  %s753_s22 = sshll.u32 %s1040_s21, 4  ;;  %s754_s22 = int_to_ptr.vmem [resolvable:$true] %s753_s22 }
  0x3f   :  { %v75_v1 = vld [vmem:[%s74_s4] sm:$0x1]  ;;  %830 = vmatpush3.bf16.msra.mxu0 %v1117_v19  ;;  %838 = vmatpush3.bf16.msra.mxu1 %v1117_v19  ;;  %s102_s30 = scalar_lea.vmem [#allocation7], %s778_s29  ;;  %s999_s23 = scalar_lea.vmem %s754_s22, 128 }
  0x40   :  { %v776_v2 = vmul.f32 -1.442695, %v75_v1  ;;  %843 = vmatprep.subr.bf16.mxu0 %v1035_v16  ;;  %851 = vmatprep.subr.bf16.mxu1 %v1035_v16  ;;  %v103_v25 = vld [vmem:[%s102_s30] sm:$0x1]  ;;  %s179_s8 = scalar_lea.vmem [#allocation7], %s782_s7  ;;  %s255_s0 = scalar_lea.vmem [#allocation7], %s786_s9 }
  0x41   :  { %v180_v47 = vld [vmem:[%s179_s8] sm:$0x1]  ;;  %s331_s11 = scalar_lea.vmem [#allocation7], %s790_s10  ;;  %s407_s13 = scalar_lea.vmem [#allocation7], %s794_s12 }
  0x42   :  { %895 = vpow2.f32 %v776_v2  ;;  %s483_s15 = scalar_lea.vmem [#allocation7], %s798_s14  ;;  %s559_s17 = scalar_lea.vmem [#allocation7], %s802_s16 }
  0x43   :  { %p1000_p7 = scmp.ne.s32.totalorder %s754_s22, %s999_s23  ;;  %p1004_p8 = scmp.lt.s32.totalorder %s754_s22, %s754_s22 }
  0x44   :  { %p1005_p9 = scmp.lt.s32.totalorder %s999_s23, %s999_s23 }
  0x46   :  { %p1006_p10 = por %p1005_p9, %p1004_p8 }
  0x48   :  { %p1007_p11 = pnand %p1006_p10, %p1000_p7 }
  0x4c   :  { %v896_v3 = vpop.eup %895 }
  0x4d   :  { %v79_v4 = vadd.f32 1.0, %v896_v3 }
  0x4f   :  { %897 = vrcp.f32 %v79_v4 }
  0x59   :  { %v898_v5 = vpop.eup %897 }
  0x5a   :  { %v82_v6 = vmul.f32 2.0, %v898_v5  ;;  %v84_v10 = vmul.f32 0.0, %v898_v5 }
  0x5c   :  { %v777_v7 = vadd.f32 -1.0, %v82_v6 }
  0x5e   :  { %86 = vrot.lane.b32.xlu0 %v777_v7, %s1034_s28 }
  0xd0   :  { %v87_v8 = vpop.permute.xlu0 %86 }
  0xd1   :  { %v89_v9 = vmul.f32 %v898_v5, %v87_v8 }
  0xd3   :  { %91 = vrot.lane.b32.xlu0 %v89_v9, %s1034_s28  ;;  %v256_v9 = vld [vmem:[%s255_s0] sm:$0x1] }
 0x145   :  { %v92_v11 = vpop.permute.xlu0 %91 }
 0x146   :  { %v94_v12 = vadd.f32 %v92_v11, %v84_v10 }
 0x148   :  { %899 = vtanh.f32 %v94_v12 }
 0x152   :  { %v900_v20 = vpop.eup %899 }
 0x153   :  { %97 = vrot.lane.b32.xlu1 %v900_v20, %s1034_s28 }
 0x1c5   :  { %v98_v21 = vpop.permute.xlu1 %97 }
 0x1c6   :  { %v1127_v22 = vmul.f32 %v898_v5, %v98_v21 }
 0x1c8   :  { %v104_v23 = vpack.c.bf16 %v1127_v22, %v1127_v22 }
 0x1ca   :  { %106 = vrot.lane.b32.xlu1 %v104_v23, %s1037_s2 }
 0x23c   :  { %v107_v24 = vpop.permute.xlu1 %106 }
 0x23d   :  { %832 = vmatmul.mubr.msk.bf16.vlgmr.msra.gmra.mrb[0].mxu0 %vm108_vm1, %v107_v24 }
 0x23e   :  { %844 = vmatpush3.bf16.msra.mxu0 %v1109_v17  ;;  %847 = vmatprep.mubr.msk.bf16.mxu0 %vm1036_vm0, %v1035_v16 }
 0x23f   :  { %845 = vmatprep.subr.bf16.mxu0 %v1035_v16 }
 0x242   :  { %846 = vmatpush3.bf16.msra.mxu0 %v1117_v19 }
 0x243   :  { %859 = vmatprep.subr.bf16.mxu0 %v1035_v16 }
 0x310   :  { %v146_v26 = vpop.f32.mrb[0].mxu0 }
 0x311   :  { %v152_v27 = vadd.f32 %v146_v26, %v103_v25  ;;  %v833_v28 = vpop.f32.mrb[1].mxu0 }
 0x312   :  { %v149_v29 = vpop.f32.mrb[2].mxu0 }
 0x313   :  { %v780_v30 = vmul.f32 -1.442695, %v152_v27  ;;  %v834_v31 = vpop.f32.mrb[3].mxu0 }
 0x315   :  { %901 = vpow2.f32 %v780_v30 }
 0x31f   :  { %v902_v32 = vpop.eup %901 }
 0x320   :  { %v156_v33 = vadd.f32 1.0, %v902_v32 }
 0x322   :  { %903 = vrcp.f32 %v156_v33 }
 0x32c   :  { %v904_v34 = vpop.eup %903 }
 0x32d   :  { %v159_v35 = vmul.f32 2.0, %v904_v34  ;;  %v161_v39 = vmul.f32 %v904_v34, %v94_v12 }
 0x32f   :  { %v781_v36 = vadd.f32 -1.0, %v159_v35 }
 0x331   :  { %163 = vrot.lane.b32.xlu0 %v781_v36, %s1034_s28  ;;  %v332_v36 = vld [vmem:[%s331_s11] sm:$0x1] }
 0x3a3   :  { %v164_v37 = vpop.permute.xlu0 %163 }
 0x3a4   :  { %v166_v38 = vmul.f32 %v904_v34, %v164_v37 }
 0x3a6   :  { %168 = vrot.lane.b32.xlu1 %v166_v38, %s1034_s28 }
 0x418   :  { %v169_v40 = vpop.permute.xlu1 %168 }
 0x419   :  { %v171_v41 = vadd.f32 %v169_v40, %v161_v39 }
 0x41b   :  { %905 = vtanh.f32 %v171_v41 }
 0x425   :  { %v906_v42 = vpop.eup %905 }
 0x426   :  { %174 = vrot.lane.b32.xlu0 %v906_v42, %s1034_s28 }
 0x498   :  { %v175_v43 = vpop.permute.xlu0 %174 }
 0x499   :  { %v177_v44 = vmul.f32 %v904_v34, %v175_v43 }
 0x49b   :  { %v181_v45 = vpack.c.bf16 %v177_v44, %v177_v44  ;;  %v635_v1 = vrot.slane %v177_v44, 7 }
 0x49d   :  { %183 = vrot.lane.b32.xlu1 %v181_v45, %s1037_s2  ;;  %v656_v6 = vsel %vm655_vm2, %v1127_v22, %v635_v1 }
 0x50f   :  { %v184_v46 = vpop.permute.xlu1 %183 }
 0x510   :  { %840 = vmatmul.mubr.msk.bf16.vlgmr.msra.gmra.mrb[0].mxu1 %vm108_vm1, %v184_v46 }
 0x511   :  { %852 = vmatpush3.bf16.msra.mxu1 %v1109_v17  ;;  %855 = vmatprep.mubr.msk.bf16.mxu1 %vm1036_vm0, %v1035_v16 }
 0x512   :  { %853 = vmatprep.subr.bf16.mxu1 %v1035_v16 }
 0x515   :  { %854 = vmatpush3.bf16.msra.mxu1 %v1117_v19 }
 0x516   :  { %867 = vmatprep.subr.bf16.mxu1 %v1035_v16 }
 0x5e3   :  { %v222_v48 = vpop.f32.mrb[0].mxu1 }
 0x5e4   :  { %v228_v49 = vadd.f32 %v222_v48, %v180_v47  ;;  %v841_v50 = vpop.f32.mrb[1].mxu1 }
 0x5e5   :  { %v225_v51 = vpop.f32.mrb[2].mxu1 }
 0x5e6   :  { %v784_v52 = vmul.f32 -1.442695, %v228_v49  ;;  %v842_v53 = vpop.f32.mrb[3].mxu1 }
 0x5e8   :  { %907 = vpow2.f32 %v784_v52 }
 0x5f2   :  { %v908_v54 = vpop.eup %907 }
 0x5f3   :  { %v232_v55 = vadd.f32 1.0, %v908_v54 }
 0x5f5   :  { %909 = vrcp.f32 %v232_v55 }
 0x5ff   :  { %v910_v56 = vpop.eup %909 }
 0x600   :  { %v235_v57 = vmul.f32 2.0, %v910_v56  ;;  %v237_v61 = vmul.f32 %v910_v56, %v171_v41 }
 0x602   :  { %v785_v58 = vadd.f32 -1.0, %v235_v57 }
 0x604   :  { %239 = vrot.lane.b32.xlu0 %v785_v58, %s1034_s28 }
 0x676   :  { %v240_v59 = vpop.permute.xlu0 %239 }
 0x677   :  { %v242_v60 = vmul.f32 %v910_v56, %v240_v59 }
 0x679   :  { %244 = vrot.lane.b32.xlu1 %v242_v60, %s1034_s28  ;;  %v408_v60 = vld [vmem:[%s407_s13] sm:$0x1] }
 0x6eb   :  { %v245_v62 = vpop.permute.xlu1 %244 }
 0x6ec   :  { %v247_v63 = vadd.f32 %v245_v62, %v237_v61 }
 0x6ee   :  { %911 = vtanh.f32 %v247_v63 }
 0x6f8   :  { %v912_v0 = vpop.eup %911 }
 0x6f9   :  { %250 = vrot.lane.b32.xlu0 %v912_v0, %s1034_s28 }
 0x76b   :  { %v251_v2 = vpop.permute.xlu0 %250 }
 0x76c   :  { %v253_v3 = vmul.f32 %v910_v56, %v251_v2 }
 0x76e   :  { %v257_v4 = vpack.c.bf16 %v253_v3, %v253_v3  ;;  %v638_v5 = vrot.slane %v253_v3, 6 }
 0x770   :  { %v658_v7 = vsel %vm657_vm3, %v656_v6, %v638_v5  ;;  %259 = vrot.lane.b32.xlu1 %v257_v4, %s1037_s2 }
 0x7e2   :  { %v260_v8 = vpop.permute.xlu1 %259 }
 0x7e3   :  { %848 = vmatmul.mubr.msk.bf16.vlgmr.msra.gmra.mrb[4].mxu0 %vm108_vm1, %v260_v8 }
 0x7e4   :  { %860 = vmatpush3.bf16.msra.mxu0 %v1109_v17  ;;  %863 = vmatprep.mubr.msk.bf16.mxu0 %vm1036_vm0, %v1035_v16 }
 0x7e5   :  { %861 = vmatprep.subr.bf16.mxu0 %v1035_v16 }
 0x7e8   :  { %862 = vmatpush3.bf16.msra.mxu0 %v1117_v19 }
 0x7e9   :  { %875 = vmatprep.subr.bf16.mxu0 %v1035_v16 }
 0x8b6   :  { %v298_v10 = vpop.f32.mrb[4].mxu0 }
 0x8b7   :  { %v304_v11 = vadd.f32 %v298_v10, %v256_v9  ;;  %v849_v12 = vpop.f32.mrb[5].mxu0 }
 0x8b8   :  { %v301_v13 = vpop.f32.mrb[6].mxu0 }
 0x8b9   :  { %v788_v14 = vmul.f32 -1.442695, %v304_v11  ;;  %v850_v15 = vpop.f32.mrb[7].mxu0 }
 0x8bb   :  { %913 = vpow2.f32 %v788_v14 }
 0x8c5   :  { %v914_v18 = vpop.eup %913 }
 0x8c6   :  { %v308_v20 = vadd.f32 1.0, %v914_v18 }
 0x8c8   :  { %915 = vrcp.f32 %v308_v20  ;;  %v484_v20 = vld [vmem:[%s483_s15] sm:$0x1] }
 0x8d2   :  { %v916_v21 = vpop.eup %915 }
 0x8d3   :  { %v311_v22 = vmul.f32 2.0, %v916_v21  ;;  %v313_v26 = vmul.f32 %v916_v21, %v247_v63 }
 0x8d5   :  { %v789_v23 = vadd.f32 -1.0, %v311_v22 }
 0x8d7   :  { %315 = vrot.lane.b32.xlu0 %v789_v23, %s1034_s28 }
 0x949   :  { %v316_v24 = vpop.permute.xlu0 %315 }
 0x94a   :  { %v318_v25 = vmul.f32 %v916_v21, %v316_v24 }
 0x94c   :  { %320 = vrot.lane.b32.xlu1 %v318_v25, %s1034_s28 }
 0x9be   :  { %v321_v27 = vpop.permute.xlu1 %320 }
 0x9bf   :  { %v323_v28 = vadd.f32 %v321_v27, %v313_v26 }
 0x9c1   :  { %917 = vtanh.f32 %v323_v28 }
 0x9cb   :  { %v918_v29 = vpop.eup %917 }
 0x9cc   :  { %326 = vrot.lane.b32.xlu0 %v918_v29, %s1034_s28 }
 0xa3e   :  { %v327_v30 = vpop.permute.xlu0 %326 }
 0xa3f   :  { %v329_v31 = vmul.f32 %v916_v21, %v327_v30 }
 0xa41   :  { %v333_v32 = vpack.c.bf16 %v329_v31, %v329_v31  ;;  %v641_v33 = vrot.slane %v329_v31, 5 }
 0xa43   :  { %v660_v34 = vsel %vm659_vm4, %v658_v7, %v641_v33  ;;  %335 = vrot.lane.b32.xlu1 %v333_v32, %s1037_s2 }
 0xab5   :  { %v336_v35 = vpop.permute.xlu1 %335 }
 0xab6   :  { %856 = vmatmul.mubr.msk.bf16.vlgmr.msra.gmra.mrb[4].mxu1 %vm108_vm1, %v336_v35 }
 0xab7   :  { %868 = vmatpush3.bf16.msra.mxu1 %v1109_v17  ;;  %871 = vmatprep.mubr.msk.bf16.mxu1 %vm1036_vm0, %v1035_v16 }
 0xab8   :  { %869 = vmatprep.subr.bf16.mxu1 %v1035_v16 }
 0xabb   :  { %870 = vmatpush3.bf16.msra.mxu1 %v1117_v19 }
 0xb89   :  { %v374_v37 = vpop.f32.mrb[4].mxu1 }
 0xb8a   :  { %v380_v38 = vadd.f32 %v374_v37, %v332_v36  ;;  %v857_v39 = vpop.f32.mrb[5].mxu1 }
 0xb8b   :  { %v377_v40 = vpop.f32.mrb[6].mxu1 }
 0xb8c   :  { %v792_v41 = vmul.f32 -1.442695, %v380_v38  ;;  %v858_v42 = vpop.f32.mrb[7].mxu1 }
 0xb8e   :  { %919 = vpow2.f32 %v792_v41 }
 0xb98   :  { %v920_v43 = vpop.eup %919 }
 0xb99   :  { %v384_v44 = vadd.f32 1.0, %v920_v43 }
 0xb9b   :  { %921 = vrcp.f32 %v384_v44  ;;  %v560_v44 = vld [vmem:[%s559_s17] sm:$0x1] }
 0xba5   :  { %v922_v45 = vpop.eup %921 }
 0xba6   :  { %v387_v46 = vmul.f32 2.0, %v922_v45  ;;  %v389_v50 = vmul.f32 %v922_v45, %v323_v28 }
 0xba8   :  { %v793_v47 = vadd.f32 -1.0, %v387_v46 }
 0xbaa   :  { %391 = vrot.lane.b32.xlu0 %v793_v47, %s1034_s28 }
 0xc1c   :  { %v392_v48 = vpop.permute.xlu0 %391 }
 0xc1d   :  { %v394_v49 = vmul.f32 %v922_v45, %v392_v48 }
 0xc1f   :  { %396 = vrot.lane.b32.xlu1 %v394_v49, %s1034_s28 }
 0xc91   :  { %v397_v51 = vpop.permute.xlu1 %396 }
 0xc92   :  { %v399_v52 = vadd.f32 %v397_v51, %v389_v50 }
 0xc94   :  { %923 = vtanh.f32 %v399_v52 }
 0xc9e   :  { %v924_v53 = vpop.eup %923 }
 0xc9f   :  { %402 = vrot.lane.b32.xlu0 %v924_v53, %s1034_s28 }
 0xd11   :  { %v403_v54 = vpop.permute.xlu0 %402 }
 0xd12   :  { %v405_v55 = vmul.f32 %v922_v45, %v403_v54 }
 0xd14   :  { %v409_v56 = vpack.c.bf16 %v405_v55, %v405_v55  ;;  %v644_v57 = vrot.slane %v405_v55, 4 }
 0xd16   :  { %v662_v58 = vsel %vm661_vm5, %v660_v34, %v644_v57  ;;  %411 = vrot.lane.b32.xlu1 %v409_v56, %s1037_s2 }
 0xd88   :  { %v412_v59 = vpop.permute.xlu1 %411 }
 0xd89   :  { %864 = vmatmul.mubr.msk.bf16.vlgmr.msra.gmra.mrb[8].mxu0 %vm108_vm1, %v412_v59 }
 0xd8a   :  { %876 = vmatpush3.bf16.msra.mxu0 %v1109_v17  ;;  %879 = vmatprep.mubr.msk.bf16.mxu0 %vm1036_vm0, %v1035_v16  ;;  %vm745_vm0 = vcmask 23552  }
 0xd8b   :  { %877 = vmatprep.subr.bf16.mxu0 %v1035_v16 }
 0xd8e   :  { %878 = vmatpush3.bf16.msra.mxu0 %v1117_v19 }
 0xe5c   :  { %v450_v61 = vpop.f32.mrb[8].mxu0 }
 0xe5d   :  { %v456_v62 = vadd.f32 %v450_v61, %v408_v60  ;;  %v865_v63 = vpop.f32.mrb[9].mxu0  ;;  %v693_v61 = vlaneseq }
 0xe5e   :  { %v453_v0 = vpop.f32.mrb[10].mxu0 }
 0xe5f   :  { %v796_v1 = vmul.f32 -1.442695, %v456_v62  ;;  %v866_v2 = vpop.f32.mrb[11].mxu0  ;;  %v694_v63 = vand.u32 127, %v693_v61 }
 0xe61   :  { %925 = vpow2.f32 %v796_v1 }
 0xe6b   :  { %v926_v3 = vpop.eup %925 }
 0xe6c   :  { %v460_v4 = vadd.f32 1.0, %v926_v3 }
 0xe6e   :  { %927 = vrcp.f32 %v460_v4 }
 0xe78   :  { %v928_v17 = vpop.eup %927 }
 0xe79   :  { %v463_v5 = vmul.f32 2.0, %v928_v17  ;;  %v465_v7 = vmul.f32 %v928_v17, %v399_v52 }
 0xe7b   :  { %v797_v6 = vadd.f32 -1.0, %v463_v5 }
 0xe7d   :  { %467 = vrot.lane.b32.xlu0 %v797_v6, %s1034_s28 }
 0xeef   :  { %v468_v16 = vpop.permute.xlu0 %467 }
 0xef0   :  { %v470_v19 = vmul.f32 %v928_v17, %v468_v16 }
 0xef2   :  { %472 = vrot.lane.b32.xlu1 %v470_v19, %s1034_s28 }
 0xf64   :  { %v473_v8 = vpop.permute.xlu1 %472 }
 0xf65   :  { %v475_v9 = vadd.f32 %v473_v8, %v465_v7 }
 0xf67   :  { %929 = vtanh.f32 %v475_v9 }
 0xf71   :  { %v930_v10 = vpop.eup %929 }
 0xf72   :  { %478 = vrot.lane.b32.xlu0 %v930_v10, %s1034_s28 }
 0xfe4   :  { %v479_v11 = vpop.permute.xlu0 %478 }
 0xfe5   :  { %v481_v12 = vmul.f32 %v928_v17, %v479_v11 }
 0xfe7   :  { %v485_v13 = vpack.c.bf16 %v481_v12, %v481_v12  ;;  %v647_v14 = vrot.slane %v481_v12, 3 }
 0xfe9   :  { %v664_v15 = vsel %vm663_vm6, %v662_v58, %v647_v14  ;;  %487 = vrot.lane.b32.xlu1 %v485_v13, %s1037_s2 }
0x105b   :  { %v488_v18 = vpop.permute.xlu1 %487 }
0x105c   :  { %872 = vmatmul.mubr.msk.bf16.vlgmr.msra.gmra.mrb[8].mxu1 %vm108_vm1, %v488_v18 }
0x112f   :  { %v526_v21 = vpop.f32.mrb[8].mxu1 }
0x1130   :  { %v532_v22 = vadd.f32 %v526_v21, %v484_v20  ;;  %v873_v23 = vpop.f32.mrb[9].mxu1 }
0x1131   :  { %v529_v24 = vpop.f32.mrb[10].mxu1 }
0x1132   :  { %v800_v25 = vmul.f32 -1.442695, %v532_v22  ;;  %v874_v26 = vpop.f32.mrb[11].mxu1  ;;  %v724_v22 = vld [vmem:[%s1227_s3] sm:$0x1]  ;;  %s1039_s3 = smov 2  }
0x1134   :  { %931 = vpow2.f32 %v800_v25 }
0x113e   :  { %v932_v27 = vpop.eup %931 }
0x113f   :  { %v536_v28 = vadd.f32 1.0, %v932_v27 }
0x1141   :  { %933 = vrcp.f32 %v536_v28 }
0x114b   :  { %v934_v29 = vpop.eup %933 }
0x114c   :  { %v539_v30 = vmul.f32 2.0, %v934_v29  ;;  %v541_v34 = vmul.f32 %v934_v29, %v475_v9 }
0x114e   :  { %v801_v31 = vadd.f32 -1.0, %v539_v30 }
0x1150   :  { %543 = vrot.lane.b32.xlu0 %v801_v31, %s1034_s28 }
0x11c2   :  { %v544_v32 = vpop.permute.xlu0 %543 }
0x11c3   :  { %v546_v33 = vmul.f32 %v934_v29, %v544_v32  ;;  %v734_v32 = vshrl.u32 %v693_v61, 7 }
0x11c5   :  { %548 = vrot.lane.b32.xlu1 %v546_v33, %s1034_s28  ;;  %v730_v33 = vld [vmem:[#allocation2] sm:$0x1] }
0x1237   :  { %v549_v35 = vpop.permute.xlu1 %548 }
0x1238   :  { %v551_v36 = vadd.f32 %v549_v35, %v541_v34  ;;  %v735_v34 = vsub.s32 0, %v734_v32 }
0x123a   :  { %935 = vtanh.f32 %v551_v36 }
0x1244   :  { %v936_v37 = vpop.eup %935 }
0x1245   :  { %554 = vrot.lane.b32.xlu0 %v936_v37, %s1034_s28 }
0x12b7   :  { %v555_v38 = vpop.permute.xlu0 %554 }
0x12b8   :  { %v557_v39 = vmul.f32 %v934_v29, %v555_v38 }
0x12ba   :  { %v561_v40 = vpack.c.bf16 %v557_v39, %v557_v39  ;;  %v650_v41 = vrot.slane %v557_v39, 2 }
0x12bc   :  { %v666_v42 = vsel %vm665_vm7, %v664_v15, %v650_v41  ;;  %563 = vrot.lane.b32.xlu1 %v561_v40, %s1037_s2 }
0x132e   :  { %v564_v43 = vpop.permute.xlu1 %563 }
0x132f   :  { %880 = vmatmul.mubr.msk.bf16.vlgmr.msra.gmra.mrb[12].mxu0 %vm108_vm1, %v564_v43 }
0x1402   :  { %v602_v45 = vpop.f32.mrb[12].mxu0 }
0x1403   :  { %v608_v46 = vadd.f32 %v602_v45, %v560_v44  ;;  %v881_v47 = vpop.f32.mrb[13].mxu0 }
0x1404   :  { %v605_v48 = vpop.f32.mrb[14].mxu0 }
0x1405   :  { %v804_v49 = vmul.f32 -1.442695, %v608_v46  ;;  %v882_v50 = vpop.f32.mrb[15].mxu0 }
0x1407   :  { %937 = vpow2.f32 %v804_v49 }
0x1411   :  { %v938_v51 = vpop.eup %937 }
0x1412   :  { %v612_v52 = vadd.f32 1.0, %v938_v51 }
0x1414   :  { %939 = vrcp.f32 %v612_v52 }
0x141e   :  { %v940_v53 = vpop.eup %939 }
0x141f   :  { %v615_v54 = vmul.f32 2.0, %v940_v53  ;;  %v617_v58 = vmul.f32 %v940_v53, %v551_v36 }
0x1421   :  { %v805_v55 = vadd.f32 -1.0, %v615_v54 }
0x1423   :  { %619 = vrot.lane.b32.xlu0 %v805_v55, %s1034_s28 }
0x1495   :  { %v620_v56 = vpop.permute.xlu0 %619 }
0x1496   :  { %v622_v57 = vmul.f32 %v940_v53, %v620_v56 }
0x1498   :  { %624 = vrot.lane.b32.xlu1 %v622_v57, %s1034_s28 }
0x150a   :  { %v625_v59 = vpop.permute.xlu1 %624 }
0x150b   :  { %v627_v60 = vadd.f32 %v625_v59, %v617_v58 }
0x150d   :  { %941 = vtanh.f32 %v627_v60 }
0x1517   :  { %v942_v62 = vpop.eup %941 }
0x1518   :  { %630 = vrot.lane.b32.xlu0 %v942_v62, %s1034_s28 }
0x151c   :  { %696 = vrot.lane.b32.xlu0 %v694_v63, %s1037_s2 }
0x158a   :  { %v631_v0 = vpop.permute.xlu0 %630 }
0x158b   :  { %v633_v1 = vmul.f32 %v940_v53, %v631_v0 }
0x158d   :  { %v653_v2 = vrot.slane %v633_v1, 1  ;;  %714 = vrot.lane.b32.xlu0 %v633_v1, %s1037_s2 }
0x158e   :  { %v697_v13 = vpop.permute.xlu0 %696 }
0x158f   :  { %v668_v3 = vsel %vm667_vm8, %v666_v42, %v653_v2 }
0x1590   :  { %v684_v4 = vsel %vm674_vm9, %v668_v3, -inf  ;;  %v675_v17 = vsel %vm674_vm9, %v668_v3, 0.0 }
0x1591   :  { %691 = vmax.xlane.f32.xlu1 %v684_v4  ;;  %v676_v5 = vrot.slane %v675_v17, 4  ;;  %v685_v10 = vrot.slane %v684_v4, 4 }
0x1593   :  { %v677_v6 = vadd.f32 %v676_v5, %v675_v17  ;;  %v686_v11 = vmax.f32 %v684_v4, %v685_v10 }
0x1595   :  { %v678_v16 = vrot.slane %v677_v6, 2  ;;  %v687_v12 = vrot.slane %v686_v11, 2 }
0x1597   :  { %v679_v19 = vadd.f32 %v678_v16, %v677_v6  ;;  %v688_v14 = vmax.f32 %v686_v11, %v687_v12 }
0x1599   :  { %v680_v7 = vrot.slane %v679_v19, 1  ;;  %v689_v15 = vrot.slane %v688_v14, 1 }
0x159b   :  { %v681_v8 = vadd.f32 %v680_v7, %v679_v19  ;;  %v690_v21 = vmax.f32 %v688_v14, %v689_v15 }
0x159d   :  { %v683_v9 = vmul.f32 0.125, %v681_v8 }
0x159f   :  { %718 = vrot.lane.b32.xlu0 %v683_v9, %s1038_s18 }
0x15ff   :  { %v715_v18 = vpop.permute.xlu0 %714 }
0x1611   :  { %v719_v20 = vpop.permute.xlu0 %718 }
0x1612   :  { %v721_v23 = vsel %vm108_vm1, %v715_v18, %v719_v20 }
0x1613   :  { %v723_v24 = vsel %vm722_vm10, %v721_v23, %v690_v21 }
0x1614   :  { %v725_v25 = vmul.f32 %v724_v22, %v723_v24 }
0x1616   :  { %v727_v26 = vsel %vm726_vm11, %v725_v25, 0.0 }
0x1617   :  { %728 = vadd.xlane.f32.xlu1 %v727_v26 }
0x161e   :  { %v692_v27 = vpop.xlane.xlu1 %691 }
0x161f   :  { %vm695_vm12 = vcmp.eq.f32.partialorder %v668_v3, %v692_v27 }
0x1620   :  { %v698_v28 = vsel %vm695_vm12, %v697_v13, 32 }
0x1621   :  { %v699_v29 = vsel %vm674_vm9, %v698_v28, 2147483647 }
0x1622   :  { %v701_v30 = vshra.s32 %v699_v29, 16  ;;  %v700_v38 = vand.u32 65535, %v699_v29 }
0x1624   :  { %v703_v31 = vcvt.s32.f32 %v701_v30  ;;  %v702_v40 = vcvt.s32.f32 %v700_v38 }
0x1626   :  { %704 = vmin.xlane.f32.xlu0 %v703_v31 }
0x16a4   :  { %v729_v35 = vpop.xlane.xlu1 %728 }
0x16a5   :  { %v731_v36 = vadd.f32 %v730_v33, %v729_v35 }
0x16a7   :  { %v736_v37 = vrot.slane %v731_v36, %v735_v34 }
0x16a9   :  { %738 = vrot.lane.b32.xlu0 %v736_v37, %s1039_s3 }
0x16b3   :  { %v705_v39 = vpop.xlane.xlu0 %704 }
0x16b4   :  { %vm706_vm13 = vcmp.eq.f32.partialorder %v703_v31, %v705_v39  ;;  %v711_v42 = vcvt.f32.s32 %v705_v39 }
0x16b5   :  { %v707_v41 = vsel %vm706_vm13, %v702_v40, inf }
0x16b6   :  { %708 = vmin.xlane.f32.xlu1 %v707_v41  ;;  %v712_v44 = vshll.u32 %v711_v42, 16 }
0x16c7   :  { %670 = vrot.lane.b32.xlu1 %v668_v3, %s1037_s2 }
0x1743   :  { %v709_v43 = vpop.xlane.xlu1 %708 }
0x1744   :  { %v710_v45 = vcvt.f32.s32 %v709_v43 }
0x1746   :  { %v713_v46 = vadd.s32 %v712_v44, %v710_v45 }
0x1747   :  { %v671_v47 = vpop.permute.xlu1 %670 }
0x1748   :  { %v732_v48 = vcvt.s32.f32 %v713_v46  ;;  %673 = vst.msk [vmem:[#allocation10] sm:$0xff] %vm108_vm1, %v671_v47 }
0x1749   :  { %1010 = shalt.err (!%p1007_p11)
}
0x174a   :  { %s1011_s1 = scalar_lea.hbm %s1229_s5, 128 }
0x174b   :  { %p1012_p12 = scmp.ne.s32.totalorder %s1229_s5, %s1011_s1  ;;  %p1015_p13 = scmp.lt.u32.totalorder %s1011_s1, %s1229_s5 }
0x174d   :  { %p1017_p0 = pnand %p1015_p13, %p1012_p12 }
0x174f   :  { %1020 = shalt.err (!%p1017_p0)
}
0x1750   :  { %756 = dma.vmem_to_hbm [thread:$0]  %s754_s22, 128, %s1229_s5, [#allocation5]   ;;  %v739_v49 = vpop.permute.xlu0 %738  ;;  %v742_v50 = vsel %vm741_vm14, %v692_v27, %v732_v48 }
0x1751   :  { %v744_v51 = vsel %vm743_vm15, %v742_v50, %v739_v49 }
0x1752   :  { %746 = vst.msk [vmem:[%s1230_s6] sm:$0xff] %vm745_vm0, %v744_v51 }
0x1753   :  { %1027 = dma.done.wait [#allocation5], 128  }
0x1754   :  { %1028 = vsyncadd [#allocation5], 4294967168 }
0x1755   :  { %764 = vsyncpa [#allocation4], 1 }
0x1756   :  { %765 = vsyncpa [#allocation9], 1 }
0x1757   :  { %766 = vsyncpa [#allocation5], 1 }
0x1758   :  { %767 = vsyncpa [#allocation6], 1 }

</bundles_post_ra>
